<compile_context>
chip_gen: v6e
topology: v6e:2x2x1
jax: 0.10.0
libtpu: 0.0.40
codegen_flags: <defaults>
</compile_context>

<pallas_src>
import jax
import jax.numpy as jnp
from jax.experimental import pallas as pl
from jax.experimental.pallas import tpu as pltpu

FC1_IN = 768
FC1_OUT = 512
FC2_OUT = 48
FC3_OUT = 2            # number of classes
LANES = 128            # lane-dense padding for the class axis
SUBLANE = 16           # bf16 sublane packing granularity
NEG_SLOPE = 0.01       # nn.LeakyReLU() default negative_slope
NEG_SENTINEL = -1e30   # baked into padded bias lanes -> no in-kernel masking


def _round_up(x, m):
    return (x + m - 1) // m * m


def bert_head_kernel(x_ref, w_ref, b_ref, o_ref):
    # Single fused matmul on the MXU: bf16 operands, f32 accumulation.
    h = jnp.dot(x_ref[...], w_ref[...],
                preferred_element_type=jnp.float32) + b_ref[...]
    # Dropout(p=0.08): identity at inference time (eval mode).
    # LeakyReLU
    h = jnp.where(h > 0, h, NEG_SLOPE * h)
    # LogSoftmax over the class axis. Padded lanes hold ~-1e28 (sentinel bias
    # through LeakyReLU), so they never win the max and exp(.) underflows to 0:
    # plain max/sum over all 128 lanes is correct without masking.
    m = jnp.max(h, axis=1, keepdims=True)
    s = jnp.sum(jnp.exp(h - m), axis=1, keepdims=True)
    # Full lane-dense bf16 store; padded lanes/rows are sliced off in the wrapper.
    o_ref[...] = (h - (m + jnp.log(s))).astype(o_ref.dtype)


def fuse_head_params(w1, b1, w2, b2, w3, b3):
    """One-time prep (hoisted out of the per-forward path).

    Folds the purely-linear chain fc1->fc2->fc3 into one (768, 2) matmul
    (fusion done in f32 before any downcast), pads the class axis to a
    lane-dense 128 slab, bakes a -1e30 sentinel into padded bias lanes,
    and downcasts W to bf16. Reuse the returned arrays across forwards.
    """
    w_fused = (w1 @ w2) @ w3                   # (768, 2), f32
    b_fused = (b1 @ w2 + b2) @ w3 + b3         # (1, 2),   f32
    w_pad = jnp.zeros((FC1_IN, LANES), jnp.float32).at[:, :FC3_OUT].set(w_fused)
    b_pad = jnp.full((1, LANES), NEG_SENTINEL, jnp.float32)
    b_pad = b_pad.at[:, :FC3_OUT].set(b_fused)
    # Bias stays f32 (tiny, added after the f32 accumulate); W goes bf16.
    return w_pad.astype(jnp.bfloat16), b_pad


def bert_head(x, w_pad, b_pad):
    """Head forward. x: (B, 768) pooled BERT output (any float dtype).

    Returns bf16 log-probs of shape (B, 2). Callers must use this sliced
    result, never the raw padded kernel output.
    """
    B = x.shape[0]

    # Batch tile: big enough to amortize the ~0.35 us/step pipeline overhead
    # (kernel is HBM-bound), but keep >=2 grid steps once B is large so the
    # "parallel" batch axis can shard across v7x's two TensorCores.
    if B <= 512:
        TM = _round_up(B, SUBLANE)
    else:
        TM = min(512, _round_up((B + 1) // 2, SUBLANE))
    Bp = _round_up(B, TM)

    x_pad = x.astype(jnp.bfloat16)
    if Bp != B:
        x_pad = jnp.pad(x_pad, ((0, Bp - B), (0, 0)))

    out = pl.pallas_call(
        bert_head_kernel,
        out_shape=jax.ShapeDtypeStruct((Bp, LANES), jnp.bfloat16),
        grid=(Bp // TM,),
        in_specs=[
            pl.BlockSpec((TM, FC1_IN), lambda i: (i, 0)),     # x tile (bf16)
            pl.BlockSpec((FC1_IN, LANES), lambda i: (0, 0)),  # fused W (resident, bf16)
            pl.BlockSpec((1, LANES), lambda i: (0, 0)),       # fused b (resident, f32)
        ],
        out_specs=pl.BlockSpec((TM, LANES), lambda i: (i, 0)),
        compiler_params=pltpu.CompilerParams(
            dimension_semantics=("parallel",)),
    )(x_pad, w_pad, b_pad)

    return out[:B, :FC3_OUT]


def head_reference(x, w1, b1, w2, b2, w3, b3):
    """Unfused f32 pure-JAX reference matching the PyTorch forward (eval mode)."""
    h = x @ w1 + b1
    h = h @ w2 + b2
    h = h @ w3 + b3
    h = jnp.where(h > 0, h, NEG_SLOPE * h)
    return jax.nn.log_softmax(h, axis=1)


def init_params(key):
    """Deterministic PyTorch-Linear-style init (uniform +/- 1/sqrt(fan_in))."""
    ks = jax.random.split(key, 6)

    def linear(kw, kb, fan_in, fan_out):
        bound = 1.0 / jnp.sqrt(fan_in)
        w = jax.random.uniform(kw, (fan_in, fan_out), jnp.float32,
                               -bound, bound)
        b = jax.random.uniform(kb, (1, fan_out), jnp.float32, -bound, bound)
        return w, b

    w1, b1 = linear(ks[0], ks[1], FC1_IN, FC1_OUT)
    w2, b2 = linear(ks[2], ks[3], FC1_OUT, FC2_OUT)
    w3, b3 = linear(ks[4], ks[5], FC2_OUT, FC3_OUT)
    return w1, b1, w2, b2, w3, b3


if __name__ == "__main__":
    key = jax.random.PRNGKey(0)
    k_x, k_p = jax.random.split(key)

    B = 8  # small batch
    # pooled BERT output stand-in: [B, 768]
    x = jax.random.normal(k_x, (B, FC1_IN), jnp.float32)
    params = init_params(k_p)

    # One-time weight fusion + padding (not part of the per-forward hot path).
    w_pad, b_pad = fuse_head_params(*params)
    w_pad, b_pad = jax.block_until_ready((w_pad, b_pad))

    head = jax.jit(bert_head)
    out = head(x, w_pad, b_pad)
    out = jax.block_until_ready(out)

    assert out.shape == (B, FC3_OUT)
    out_f32 = out.astype(jnp.float32)

    # sanity 1: log-softmax rows exponentiate-sum to ~1 (bf16 storage noise)
    row_sums = jnp.sum(jnp.exp(out_f32), axis=1)
    assert bool(jnp.all(jnp.abs(row_sums - 1.0) < 3e-2))

    # sanity 2: fused bf16 kernel matches the unfused f32 reference
    ref = head_reference(x, *params)
    assert bool(jnp.all(jnp.abs(out_f32 - ref) < 5e-2))

    print("KERNEL_OK")
</pallas_src>

<mosaic_0001>
module attributes {stable_mosaic.version = 11 : i64} {
  func.func @bert_head_kernel(%arg0: i32, %arg1: memref<16x768xbf16, #tpu.memory_space<vmem>>, %arg2: memref<768x128xbf16, #tpu.memory_space<vmem>>, %arg3: memref<1x128xf32, #tpu.memory_space<vmem>>, %arg4: memref<16x128xbf16, #tpu.memory_space<vmem>>) attributes {dimension_semantics = [#tpu.dimension_semantics<parallel>], iteration_bounds = array<i64: 1>, scalar_prefetch = 0 : i64, scratch_operands = 0 : i64, tpu.core_type = #tpu.core_type<tc>, window_params = [{transform_indices = @transform_0, window_bounds = array<i64: 16, 768>}, {pipeline_mode = #tpu.pipeline_mode<synchronous>, transform_indices = @transform_1, window_bounds = array<i64: 768, 128>}, {pipeline_mode = #tpu.pipeline_mode<synchronous>, transform_indices = @transform_2, window_bounds = array<i64: 1, 128>}, {transform_indices = @transform_3, window_bounds = array<i64: 16, 128>}]} {
    %c0 = arith.constant 0 : index
    %c0_0 = arith.constant 0 : index
    %0 = vector.load %arg1[%c0, %c0_0] : memref<16x768xbf16, #tpu.memory_space<vmem>>, vector<16x768xbf16>
    %c0_1 = arith.constant 0 : index
    %c0_2 = arith.constant 0 : index
    %1 = vector.load %arg2[%c0_1, %c0_2] : memref<768x128xbf16, #tpu.memory_space<vmem>>, vector<768x128xbf16>
    %cst = arith.constant dense<0.000000e+00> : vector<16x128xf32>
    %2 = tpu.matmul %0, %1, %cst {dimension_numbers = #tpu.dot_dimension_numbers<[1], [0], [0], [1], [0, 0, 1, 1], [], []>} : vector<16x768xbf16>, vector<768x128xbf16>, vector<16x128xf32> -> vector<16x128xf32>
    %c0_3 = arith.constant 0 : index
    %c0_4 = arith.constant 0 : index
    %3 = vector.load %arg3[%c0_3, %c0_4] : memref<1x128xf32, #tpu.memory_space<vmem>>, vector<1x128xf32>
    %4 = vector.broadcast %3 : vector<1x128xf32> to vector<16x128xf32>
    %5 = arith.addf %2, %4 : vector<16x128xf32>
    %cst_5 = arith.constant 0.000000e+00 : f32
    %6 = vector.broadcast %cst_5 : f32 to vector<16x128xf32>
    %7 = arith.cmpf ogt, %5, %6 : vector<16x128xf32>
    %cst_6 = arith.constant 0.00999999977 : f32
    %8 = vector.broadcast %cst_6 : f32 to vector<16x128xf32>
    %9 = arith.mulf %8, %5 : vector<16x128xf32>
    %10 = arith.select %7, %5, %9 : vector<16x128xi1>, vector<16x128xf32>
    %cst_7 = arith.constant dense<0xFF800000> : vector<16xf32>
    %11 = vector.multi_reduction <maximumf>, %10, %cst_7 [1] : vector<16x128xf32> to vector<16xf32>
    %12 = vector.shape_cast %11 : vector<16xf32> to vector<16x1xf32>
    %13 = vector.broadcast %12 : vector<16x1xf32> to vector<16x128xf32>
    %14 = arith.subf %10, %13 : vector<16x128xf32>
    %15 = math.exp %14 : vector<16x128xf32>
    %cst_8 = arith.constant dense<0.000000e+00> : vector<16xf32>
    %16 = vector.multi_reduction <add>, %15, %cst_8 [1] : vector<16x128xf32> to vector<16xf32>
    %17 = vector.shape_cast %16 : vector<16xf32> to vector<16x1xf32>
    %18 = math.log %17 : vector<16x1xf32>
    %19 = arith.addf %12, %18 : vector<16x1xf32>
    %20 = vector.broadcast %19 : vector<16x1xf32> to vector<16x128xf32>
    %21 = arith.subf %10, %20 : vector<16x128xf32>
    %22 = arith.truncf %21 : vector<16x128xf32> to vector<16x128xbf16>
    %c0_9 = arith.constant 0 : index
    %c0_10 = arith.constant 0 : index
    %23 = vector.load %arg4[%c0_9, %c0_10] : memref<16x128xbf16, #tpu.memory_space<vmem>>, vector<16x128xbf16>
    tpu.vector_store %arg4[%c0_9, %c0_10], %22 {strides = array<i32>} : memref<16x128xbf16, #tpu.memory_space<vmem>>, vector<16x128xbf16>,
    return
  }
  func.func @transform_0(%arg0: i32) -> (i32, i32) {
    %c0_i32 = arith.constant 0 : i32
    %c0_i32_0 = arith.constant 0 : i32
    return %arg0, %c0_i32 : i32, i32
  }
  func.func @transform_1(%arg0: i32) -> (i32, i32) {
    %c0_i32 = arith.constant 0 : i32
    %c0_i32_0 = arith.constant 0 : i32
    %c0_i32_1 = arith.constant 0 : i32
    return %c0_i32, %c0_i32_0 : i32, i32
  }
  func.func @transform_2(%arg0: i32) -> (i32, i32) {
    %c0_i32 = arith.constant 0 : i32
    %c0_i32_0 = arith.constant 0 : i32
    %c0_i32_1 = arith.constant 0 : i32
    return %c0_i32, %c0_i32_0 : i32, i32
  }
  func.func @transform_3(%arg0: i32) -> (i32, i32) {
    %c0_i32 = arith.constant 0 : i32
    %c0_i32_0 = arith.constant 0 : i32
    return %arg0, %c0_i32 : i32, i32
  }
}

</mosaic_0001>

<bundles_post_ra>
// kernel: bert_head.1
= control target key start
LH: loop header
LB: loop body
LE: loop exit
PB: predicated region body
PF: predicated region fallthrough
CT: control target
= control target key end

     0   :  { %8 = vsyncpa [#allocation3], 0  ;;  %s842_s12 = smov [#allocation2]   ;;  %s892_s0 = inlined_call_operand.vmem [shape: bf16[16,768], index: 0, kind: input, shape index: {}]   ;;  %s893_s1 = inlined_call_operand.hbm [shape: bf16[768,128], index: 1, kind: input, shape index: {}]   ;;  %s894_s2 = inlined_call_operand.vmem [shape: f32[1,128], index: 2, kind: input, shape index: {}]   ;;  %s895_s3 = inlined_call_operand.vmem [shape: bf16[16,128], index: 3, kind: output, shape index: {}]  }
   0x1   :  { %s16_s13 = sshll.u32 %s842_s12, 4  ;;  %s17_s13 = int_to_ptr.vmem [resolvable:$true] %s16_s13 }
   0x2   :  { %s828_s14 = scalar_lea.vmem %s17_s13, 6144  ;;  %p833_p1 = scmp.lt.s32.totalorder %s17_s13, %s17_s13 }
   0x3   :  { %p829_p0 = scmp.ne.s32.totalorder %s17_s13, %s828_s14  ;;  %p834_p2 = scmp.lt.s32.totalorder %s828_s14, %s828_s14 }
   0x5   :  { %p835_p3 = por %p834_p2, %p833_p1 }
   0x7   :  { %p836_p4 = pnand %p835_p3, %p829_p0 }
   0x9   :  { %839 = shalt.err (!%p836_p4)
}
   0xa   :  { %s843_s15 = smov 64   ;;  %s844_s16 = smov 4  }
   0xb   :  { %22 = dma.hbm_to_vmem [thread:$0]  %s893_s1, 6144, %s17_s13, [#allocation3], %s843_s15, %s843_s15, %s844_s16  }
   0xc   :  { %840 = dma.done.wait [#allocation3], 6144  }
   0xd   :  { %841 = vsyncadd [#allocation3], 4294961152  ;;  %v755_v0 = vld [vmem:[#allocation2 + $0x78] sm:$0xff]   ;;  %v759_v4 = vld [vmem:[#allocation2 + $0x70] sm:$0xff]  }
   0xe   :  { %v756_v1 = vld [vmem:[#allocation2 + $0x38] sm:$0xff]   ;;  %686 = vmatprep.subr.bf16.mxu0 %v755_v0  ;;  %v760_v5 = vld [vmem:[#allocation2 + $0x30] sm:$0xff]   ;;  %v763_v8 = vld [vmem:[#allocation2 + $0x68] sm:$0xff]  }
   0xf   :  { %v757_v2 = vld [vmem:[#allocation2 + $0xf8] sm:$0xff]   ;;  %687 = vmatpush3.bf16.msra.mxu0 %v756_v1  ;;  %v761_v6 = vld [vmem:[#allocation2 + $0xf0] sm:$0xff]   ;;  %v764_v9 = vld [vmem:[#allocation2 + $0x28] sm:$0xff]  }
  0x10   :  { %v758_v3 = vld [vmem:[#allocation2 + $0xb8] sm:$0xff]   ;;  %708 = vmatprep.subr.bf16.mxu1 %v757_v2  ;;  %688 = vmatprep.subr.bf16.mxu0 %v759_v4  ;;  %v762_v7 = vld [vmem:[#allocation2 + $0xb0] sm:$0xff]   ;;  %v765_v10 = vld [vmem:[#allocation2 + $0xe8] sm:$0xff]  }
  0x11   :  { %709 = vmatpush3.bf16.msra.mxu1 %v758_v3  ;;  %v766_v11 = vld [vmem:[#allocation2 + $0xa8] sm:$0xff]   ;;  %v767_v12 = vld [vmem:[#allocation2 + $0x60] sm:$0xff]   ;;  %v771_v16 = vld [vmem:[#allocation2 + $0x58] sm:$0xff]  }
  0x12   :  { %710 = vmatprep.subr.bf16.mxu1 %v761_v6  ;;  %v768_v13 = vld [vmem:[#allocation2 + $0x20] sm:$0xff]   ;;  %v772_v17 = vld [vmem:[#allocation2 + $0x18] sm:$0xff]   ;;  %v775_v20 = vld [vmem:[#allocation2 + $0x50] sm:$0xff]  }
  0x13   :  { %689 = vmatpush3.bf16.msra.mxu0 %v760_v5  ;;  %v769_v14 = vld [vmem:[#allocation2 + $0xe0] sm:$0xff]   ;;  %v773_v18 = vld [vmem:[#allocation2 + $0xd8] sm:$0xff]   ;;  %v776_v21 = vld [vmem:[#allocation2 + $0x10] sm:$0xff]  }
  0x14   :  { %690 = vmatprep.subr.bf16.mxu0 %v763_v8  ;;  %v770_v15 = vld [vmem:[#allocation2 + $0xa0] sm:$0xff]   ;;  %v774_v19 = vld [vmem:[#allocation2 + $0x98] sm:$0xff]   ;;  %v777_v22 = vld [vmem:[#allocation2 + $0xd0] sm:$0xff]  }
  0x15   :  { %711 = vmatpush3.bf16.msra.mxu1 %v762_v7  ;;  %v778_v23 = vld [vmem:[#allocation2 + $0x90] sm:$0xff]   ;;  %v779_v24 = vld [vmem:[#allocation2 + $0x48] sm:$0xff]   ;;  %v783_v28 = vld [vmem:[#allocation2 + $0x40] sm:$0xff]  }
  0x16   :  { %712 = vmatprep.subr.bf16.mxu1 %v765_v10  ;;  %v780_v25 = vld [vmem:[#allocation2 + $0x8] sm:$0xff]   ;;  %v784_v29 = vld [vmem:[#allocation2] sm:$0xff]   ;;  %v790_v34 = vld [vmem:[#allocation2 + $0x178] sm:$0xff]  }
  0x17   :  { %691 = vmatpush3.bf16.msra.mxu0 %v764_v9  ;;  %v781_v26 = vld [vmem:[#allocation2 + $0xc8] sm:$0xff]   ;;  %v785_v30 = vld [vmem:[#allocation2 + $0xc0] sm:$0xff]   ;;  %v794_v37 = vld [vmem:[#allocation2 + $0x138] sm:$0xff]  }
  0x18   :  { %692 = vmatprep.subr.bf16.mxu0 %v767_v12  ;;  %v782_v27 = vld [vmem:[#allocation2 + $0x88] sm:$0xff]   ;;  %v786_v31 = vld [vmem:[%s892_s0] ss:$24 sps:$4 sm:$0xff]   ;;  %v788_v32 = vld [vmem:[%s892_s0 + $0x4] ss:$24 sps:$4 sm:$0xff]  }
  0x19   :  { %713 = vmatpush3.bf16.msra.mxu1 %v766_v11  ;;  %v789_v33 = vld [vmem:[#allocation2 + $0x80] sm:$0xff]   ;;  %488 = vmatprep.mubr.bf16.mxu0 %v788_v32  ;;  %v795_v38 = vld [vmem:[#allocation2 + $0x170] sm:$0xff]   ;;  %v797_v40 = vld [vmem:[#allocation2 + $0x168] sm:$0xff]  }
  0x1a   :  { %714 = vmatprep.subr.bf16.mxu1 %v769_v14  ;;  %v791_v35 = vld [vmem:[%s892_s0 + $0x8] ss:$24 sps:$4 sm:$0xff]   ;;  %v793_v36 = vld [vmem:[%s892_s0 + $0xc] ss:$24 sps:$4 sm:$0xff]   ;;  %v796_v39 = vld [vmem:[#allocation2 + $0x130] sm:$0xff]  }
  0x1b   :  { %693 = vmatpush3.bf16.msra.mxu0 %v768_v13  ;;  %529 = vmatprep.mubr.bf16.mxu1 %v793_v36  ;;  %v798_v41 = vld [vmem:[#allocation2 + $0x128] sm:$0xff]   ;;  %v799_v42 = vld [vmem:[#allocation2 + $0x160] sm:$0xff]   ;;  %v801_v44 = vld [vmem:[#allocation2 + $0x158] sm:$0xff]  }
  0x1c   :  { %694 = vmatprep.subr.bf16.mxu0 %v771_v16  ;;  %v800_v43 = vld [vmem:[#allocation2 + $0x120] sm:$0xff]   ;;  %v802_v45 = vld [vmem:[#allocation2 + $0x118] sm:$0xff]   ;;  %v803_v46 = vld [vmem:[#allocation2 + $0x150] sm:$0xff]  }
  0x1d   :  { %715 = vmatpush3.bf16.msra.mxu1 %v770_v15  ;;  %v811_v47 = vld [vmem:[%s892_s0 + $0x14] ss:$24 sps:$4 sm:$0xff]   ;;  %v807_v51 = vld [vmem:[#allocation2 + $0x140] sm:$0xff]   ;;  %v809_v53 = vld [vmem:[%s892_s0 + $0x10] ss:$24 sps:$4 sm:$0xff]  }
  0x1e   :  { %716 = vmatprep.subr.bf16.mxu1 %v773_v18  ;;  %v804_v48 = vld [vmem:[#allocation2 + $0x110] sm:$0xff]   ;;  %v805_v49 = vld [vmem:[#allocation2 + $0x148] sm:$0xff]   ;;  %v808_v52 = vld [vmem:[#allocation2 + $0x100] sm:$0xff]  }
  0x1f   :  { %695 = vmatpush3.bf16.msra.mxu0 %v772_v17  ;;  %v806_v50 = vld [vmem:[#allocation2 + $0x108] sm:$0xff]   ;;  %v622_v60 = vld [vmem:[%s894_s2] ss:$0 sm:$0xff] }
  0x20   :  { %696 = vmatprep.subr.bf16.mxu0 %v775_v20 }
  0x21   :  { %717 = vmatpush3.bf16.msra.mxu1 %v774_v19 }
  0x22   :  { %718 = vmatprep.subr.bf16.mxu1 %v777_v22 }
  0x23   :  { %697 = vmatpush3.bf16.msra.mxu0 %v776_v21 }
  0x24   :  { %698 = vmatprep.subr.bf16.mxu0 %v779_v24 }
  0x25   :  { %719 = vmatpush3.bf16.msra.mxu1 %v778_v23 }
  0x26   :  { %720 = vmatprep.subr.bf16.mxu1 %v781_v26 }
  0x27   :  { %699 = vmatpush3.bf16.msra.mxu0 %v780_v25 }
  0x28   :  { %700 = vmatprep.subr.bf16.mxu0 %v783_v28 }
  0x29   :  { %721 = vmatpush3.bf16.msra.mxu1 %v782_v27 }
  0x2a   :  { %722 = vmatprep.subr.bf16.mxu1 %v785_v30 }
  0x2b   :  { %701 = vmatpush3.bf16.msra.mxu0 %v784_v29 }
  0x2c   :  { %730 = vmatprep.subr.bf16.mxu0 %v790_v34 }
  0x2d   :  { %723 = vmatpush3.bf16.msra.mxu1 %v789_v33 }
  0x2e   :  { %489 = vmatmul.mubr.bf16.vlgmr.msra.gmra.mxu0 %v786_v31 }
  0x2f   :  { %731 = vmatpush3.bf16.msra.mxu0 %v794_v37  ;;  %570 = vmatprep.mubr.bf16.mxu0 %v811_v47 }
  0x30   :  { %530 = vmatmul.mubr.bf16.vlgmr.msra.gmra.mxu1 %v791_v35  ;;  %732 = vmatprep.subr.bf16.mxu0 %v795_v38 }
  0x33   :  { %733 = vmatpush3.bf16.msra.mxu0 %v796_v39 }
  0x34   :  { %734 = vmatprep.subr.bf16.mxu0 %v797_v40 }
  0x37   :  { %735 = vmatpush3.bf16.msra.mxu0 %v798_v41 }
  0x38   :  { %736 = vmatprep.subr.bf16.mxu0 %v799_v42 }
  0x3b   :  { %737 = vmatpush3.bf16.msra.mxu0 %v800_v43 }
  0x3c   :  { %738 = vmatprep.subr.bf16.mxu0 %v801_v44 }
  0x3f   :  { %739 = vmatpush3.bf16.msra.mxu0 %v802_v45 }
  0x40   :  { %740 = vmatprep.subr.bf16.mxu0 %v803_v46 }
  0x43   :  { %741 = vmatpush3.bf16.msra.mxu0 %v804_v48 }
  0x44   :  { %742 = vmatprep.subr.bf16.mxu0 %v805_v49 }
  0x47   :  { %743 = vmatpush3.bf16.msra.mxu0 %v806_v50 }
  0x48   :  { %744 = vmatprep.subr.bf16.mxu0 %v807_v51 }
  0x4b   :  { %745 = vmatpush3.bf16.msra.mxu0 %v808_v52 }
  0x4e   :  { %571 = vmatmul.mubr.bf16.vlgmr.msra.gmra.mxu0 %v809_v53 }
  0xee   :  { %v702_v54 = vpop.f32.mrf.mxu0 }
  0xf0   :  { %v703_v55 = vpop.f32.mrf.mxu0  ;;  %v724_v56 = vpop.f32.mrf.mxu1 }
  0xf1   :  { %v704_v59 = vadd.f32 %v703_v55, %v702_v54 }
  0xf2   :  { %v705_v57 = vpop.f32.mrf.mxu0  ;;  %v725_v58 = vpop.f32.mrf.mxu1 }
  0xf3   :  { %v491_v63 = vadd.f32 %v704_v59, %v622_v60  ;;  %v726_v0 = vadd.f32 %v725_v58, %v724_v56 }
  0xf4   :  { %v706_v61 = vpop.f32.mrf.mxu0  ;;  %v727_v62 = vpop.f32.mrf.mxu1 }
  0xf5   :  { %v707_v1 = vadd.f32 %v706_v61, %v705_v57  ;;  %v532_v5 = vadd.f32 %v726_v0, %v491_v63 }
  0xf6   :  { %v728_v2 = vpop.f32.mrf.mxu1 }
  0xf7   :  { %v494_v6 = vadd.f32 %v707_v1, %v622_v60  ;;  %v729_v7 = vadd.f32 %v728_v2, %v727_v62 }
  0xf9   :  { %v535_v12 = vadd.f32 %v729_v7, %v494_v6 }
 0x10e   :  { %v746_v3 = vpop.f32.mrf.mxu0 }
 0x110   :  { %v747_v4 = vpop.f32.mrf.mxu0 }
 0x111   :  { %v748_v8 = vadd.f32 %v747_v4, %v746_v3 }
 0x112   :  { %v749_v9 = vpop.f32.mrf.mxu0 }
 0x113   :  { %v573_v10 = vadd.f32 %v748_v8, %v532_v5 }
 0x114   :  { %v750_v11 = vpop.f32.mrf.mxu0 }
 0x115   :  { %v751_v13 = vadd.f32 %v750_v11, %v749_v9  ;;  %vm579_vm0 = vcmp.gt.f32.partialorder %v573_v10, 0.0  ;;  %v581_v14 = vmul.f32 0.01, %v573_v10 }
 0x117   :  { %v576_v15 = vadd.f32 %v751_v13, %v535_v12  ;;  %v583_v16 = vsel %vm579_vm0, %v573_v10, %v581_v14 }
 0x118   :  { %585 = vmax.xlane.f32.xlu0 %v583_v16 }
 0x119   :  { %vm580_vm1 = vcmp.gt.f32.partialorder %v576_v15, 0.0  ;;  %v582_v17 = vmul.f32 0.01, %v576_v15 }
 0x11b   :  { %v584_v18 = vsel %vm580_vm1, %v576_v15, %v582_v17 }
 0x11c   :  { %587 = vmax.xlane.f32.xlu0 %v584_v18 }
 0x1a1   :  { %v586_v19 = vpop.xlane.xlu0 %585 }
 0x1a2   :  { %v589_v20 = vsub.f32 %v583_v16, %v586_v19 }
 0x1a4   :  { %v591_v21 = vmul.f32 1.442695, %v589_v20 }
 0x1a5   :  { %v588_v22 = vpop.xlane.xlu0 %587 }
 0x1a6   :  { %812 = vpow2.f32 %v591_v21  ;;  %v590_v23 = vsub.f32 %v584_v18, %v588_v22 }
 0x1a8   :  { %v593_v24 = vmul.f32 1.442695, %v590_v23 }
 0x1aa   :  { %814 = vpow2.f32 %v593_v24 }
 0x1b3   :  { %v813_v25 = vpop.eup %812 }
 0x1b4   :  { %595 = vadd.xlane.f32.xlu1 %v813_v25 }
 0x1b7   :  { %v815_v26 = vpop.eup %814 }
 0x1b8   :  { %597 = vadd.xlane.f32.xlu1 %v815_v26 }
 0x23d   :  { %v596_v27 = vpop.xlane.xlu1 %595 }
 0x23e   :  { %816 = vlog2.f32 %v596_v27 }
 0x241   :  { %v598_v28 = vpop.xlane.xlu1 %597 }
 0x242   :  { %818 = vlog2.f32 %v598_v28 }
 0x24b   :  { %v817_v29 = vpop.eup %816 }
 0x24c   :  { %v600_v30 = vmul.f32 0.6931472, %v817_v29 }
 0x24e   :  { %v603_v32 = vadd.f32 %v600_v30, %v586_v19 }
 0x24f   :  { %v819_v31 = vpop.eup %818 }
 0x250   :  { %v602_v33 = vmul.f32 0.6931472, %v819_v31  ;;  %v605_v35 = vsub.f32 %v583_v16, %v603_v32 }
 0x252   :  { %v604_v34 = vadd.f32 %v602_v33, %v588_v22 }
 0x254   :  { %v606_v36 = vsub.f32 %v584_v18, %v604_v34 }
 0x256   :  { %v684_v37 = vpack.c.bf16 %v606_v36, %v605_v35 }
 0x258   :  { %685 = vst [vmem:[%s895_s3] sm:$0xff] %v684_v37  }
 0x259   :  { %621 = vsyncpa [#allocation3], 1 }

</bundles_post_ra>
